<compile_context>
chip_gen: v7x
topology: tpu7x:2x2x1
jax: 0.10.0
libtpu: 0.0.40
codegen_flags: <defaults>
</compile_context>

<pallas_src>
import functools

import jax
import jax.numpy as jnp
from jax.experimental import pallas as pl
from jax.experimental.pallas import tpu as pltpu


def _dwconv_bn_kernel(x_ref, w_ref, gamma_ref, beta_ref, o_ref, xp_ref, *, H, W, eps):
    # x_ref     : (N, H, W, Ct)        un-padded input tile (channels on lanes)
    # w_ref     : (9, Ct)              depthwise taps, row index = 3*kh + kw
    # gamma_ref : (1, Ct)
    # beta_ref  : (1, Ct)
    # o_ref     : (N, H, W, Ct)
    # xp_ref    : (N, H+2, W+2, Ct)    VMEM scratch holding the zero-padded tile
    N = x_ref.shape[0]
    Ct = x_ref.shape[-1]

    # ---- in-kernel halo: zero the scratch, write the interior (no wrapper pad) ----
    # Zero every step (cheap, ~tens of stores) so correctness does not depend on
    # which TensorCore ran which grid step when the channel axis is "parallel".
    xp_ref[...] = jnp.zeros_like(xp_ref)
    xp_ref[:, 1:H + 1, 1:W + 1, :] = x_ref[...].astype(jnp.float32)
    xp = xp_ref[...]

    # ---- depthwise 3x3 conv: 3 W-shifted (sublane) views, reused over the 3 kh taps ----
    w = w_ref[...]                                   # (9, Ct)
    views = (xp[:, :, 0:W, :],                       # kw = 0  (w-1, zero-padded)
             xp[:, :, 1:W + 1, :],                   # kw = 1  (w)
             xp[:, :, 2:W + 2, :])                   # kw = 2  (w+1, zero-padded)
    acc = jnp.zeros((N, H, W, Ct), jnp.float32)
    for kh in range(3):
        for kw in range(3):
            acc = acc + views[kw][:, kh:kh + H, :, :] * w[3 * kh + kw, :]

    # ---- BatchNorm2d (training mode): batch stats over (N,H,W), biased variance ----
    # Single pass: var = E[y^2] - mean^2 (f32 accumulation; inputs are moderate scale).
    cnt = float(N * H * W)
    s1 = jnp.sum(acc, axis=(0, 1, 2), keepdims=True)           # (1,1,1,Ct)
    s2 = jnp.sum(acc * acc, axis=(0, 1, 2), keepdims=True)     # (1,1,1,Ct)
    mean = s1 * (1.0 / cnt)
    var = s2 * (1.0 / cnt) - mean * mean
    inv = jax.lax.rsqrt(var + eps)

    gamma = gamma_ref[...][0]                        # (Ct,)
    beta = beta_ref[...][0]                          # (Ct,)
    scale = inv * gamma                              # (1,1,1,Ct)
    shift = beta - mean * scale                      # (1,1,1,Ct)
    o_ref[...] = (acc * scale + shift).astype(o_ref.dtype)     # one FMA per element


def _pick_c_tile(C):
    """2 grid steps when possible (keeps both v7x TCs busy); else a single step."""
    if C % 2 == 0 and (C // 2) % 128 == 0:
        return C // 2
    if C % 128 == 0:
        return C
    raise ValueError(f"channel count {C} must be a multiple of 128")


def dwconv3x3_bn_nhwc(x_nhwc, weight, gamma, beta, *, eps=1e-5, c_tile=None):
    """Fused depthwise-conv3x3 + train-mode BN.  x_nhwc: (N,H,W,C), weight: (C,1,3,3)."""
    N, H, W, C = x_nhwc.shape
    if c_tile is None:
        c_tile = _pick_c_tile(C)
    assert C % c_tile == 0 and (c_tile % 128 == 0 or c_tile == C)
    # NOTE: BN statistics need the whole batch in one block; VMEM per block is
    # ~N*(H+2)*(W+2)*c_tile*4 B plus double-buffered I/O (<2 MB at C=2304, N=1),
    # comfortably within v5e/v6e (128 MiB) and v7x (64 MiB).

    w9c = jnp.transpose(weight.reshape(C, 9), (1, 0)).astype(jnp.float32)   # (9, C), tiny
    gamma2 = gamma.reshape(1, C).astype(jnp.float32)
    beta2 = beta.reshape(1, C).astype(jnp.float32)

    kernel = functools.partial(_dwconv_bn_kernel, H=H, W=W, eps=eps)

    return pl.pallas_call(
        kernel,
        out_shape=jax.ShapeDtypeStruct((N, H, W, C), jnp.float32),
        grid=(C // c_tile,),
        in_specs=[
            pl.BlockSpec((N, H, W, c_tile), lambda c: (0, 0, 0, c)),
            pl.BlockSpec((9, c_tile), lambda c: (0, c)),
            pl.BlockSpec((1, c_tile), lambda c: (0, c)),
            pl.BlockSpec((1, c_tile), lambda c: (0, c)),
        ],
        out_specs=pl.BlockSpec((N, H, W, c_tile), lambda c: (0, 0, 0, c)),
        scratch_shapes=[pltpu.VMEM((N, H + 2, W + 2, c_tile), jnp.float32)],
        compiler_params=pltpu.CompilerParams(dimension_semantics=("parallel",)),
    )(x_nhwc.astype(jnp.float32), w9c, gamma2, beta2)


def dwconv3x3_bn_nchw(x_nchw, weight, gamma, beta, *, eps=1e-5, c_tile=None):
    """Drop-in NCHW shim around the NHWC-native fused op (layout glue only)."""
    x_nhwc = jnp.transpose(x_nchw, (0, 2, 3, 1))
    out = dwconv3x3_bn_nhwc(x_nhwc, weight, gamma, beta, eps=eps, c_tile=c_tile)
    return jnp.transpose(out, (0, 3, 1, 2))


def _reference_nchw(x_nchw, weight, gamma, beta, eps=1e-5):
    """Pure-JAX reference (depthwise 3x3 conv + train-mode BN), two-pass stats."""
    N, C, H, W = x_nchw.shape
    x = x_nchw.astype(jnp.float32)
    xp = jnp.pad(x, ((0, 0), (0, 0), (1, 1), (1, 1)))
    w = weight.reshape(C, 3, 3).astype(jnp.float32)
    acc = jnp.zeros_like(x)
    for dh in range(3):
        for dw in range(3):
            acc = acc + xp[:, :, dh:dh + H, dw:dw + W] * w[:, dh, dw][None, :, None, None]
    mean = acc.mean(axis=(0, 2, 3), keepdims=True)
    var = ((acc - mean) ** 2).mean(axis=(0, 2, 3), keepdims=True)
    return ((acc - mean) * jax.lax.rsqrt(var + eps)
            * gamma[None, :, None, None] + beta[None, :, None, None])


if __name__ == "__main__":
    # Small shapes consistent with the module: depthwise 3x3 over C channels,
    # 7x7 spatial (original was [1, 2304, 7, 7]); C shrunk to 256 -> grid of 2.
    N, C, H, W = 1, 256, 7, 7

    key = jax.random.PRNGKey(0)
    kx, kw, kg, kb = jax.random.split(key, 4)
    x_nchw = jax.random.normal(kx, (N, C, H, W), dtype=jnp.float32)          # module layout
    weight = jax.random.normal(kw, (C, 1, 3, 3), dtype=jnp.float32) * 0.1    # Conv2d weight
    gamma = 1.0 + 0.1 * jax.random.normal(kg, (C,), dtype=jnp.float32)       # BN weight
    beta = 0.1 * jax.random.normal(kb, (C,), dtype=jnp.float32)              # BN bias

    # One-time layout conversion by the caller; the fused op itself is NHWC-native
    # (no pad / transpose XLA ops around the pallas_call).
    x_nhwc = jnp.transpose(x_nchw, (0, 2, 3, 1))

    out_nhwc = dwconv3x3_bn_nhwc(x_nhwc, weight, gamma, beta)
    out_nhwc = jax.block_until_ready(out_nhwc)

    ref_nchw = _reference_nchw(x_nchw, weight, gamma, beta)
    ref_nhwc = jnp.transpose(ref_nchw, (0, 2, 3, 1))

    assert out_nhwc.shape == (N, H, W, C)
    err = float(jnp.max(jnp.abs(out_nhwc - ref_nhwc)))
    assert jnp.allclose(out_nhwc, ref_nhwc, rtol=1e-4, atol=1e-4), err

    # Also verify the NCHW drop-in shim matches the PyTorch-layout semantics.
    out_nchw = jax.block_until_ready(dwconv3x3_bn_nchw(x_nchw, weight, gamma, beta))
    assert out_nchw.shape == (N, C, H, W)
    assert jnp.allclose(out_nchw, ref_nchw, rtol=1e-4, atol=1e-4)

    print("KERNEL_OK")
</pallas_src>

<mosaic_0001>
module attributes {stable_mosaic.version = 11 : i64} {
  func.func @_dwconv_bn_kernel(%arg0: i32, %arg1: memref<1x7x7x128xf32, #tpu.memory_space<vmem>>, %arg2: memref<9x128xf32, #tpu.memory_space<vmem>>, %arg3: memref<1x128xf32, #tpu.memory_space<vmem>>, %arg4: memref<1x128xf32, #tpu.memory_space<vmem>>, %arg5: memref<1x7x7x128xf32, #tpu.memory_space<vmem>>, %arg6: memref<1x9x9x128xf32, #tpu.memory_space<vmem>>) attributes {dimension_semantics = [#tpu.dimension_semantics<parallel>], iteration_bounds = array<i64: 2>, scalar_prefetch = 0 : i64, scratch_operands = 1 : i64, tpu.core_type = #tpu.core_type<tc>, window_params = [{transform_indices = @transform_0, window_bounds = array<i64: 1, 7, 7, 128>}, {transform_indices = @transform_1, window_bounds = array<i64: 9, 128>}, {transform_indices = @transform_2, window_bounds = array<i64: 1, 128>}, {transform_indices = @transform_3, window_bounds = array<i64: 1, 128>}, {transform_indices = @transform_4, window_bounds = array<i64: 1, 7, 7, 128>}]} {
    %cst = arith.constant 0.000000e+00 : f32
    %0 = vector.broadcast %cst : f32 to vector<1x9x9x128xf32>
    %c0 = arith.constant 0 : index
    %c0_0 = arith.constant 0 : index
    %c0_1 = arith.constant 0 : index
    %c0_2 = arith.constant 0 : index
    %1 = vector.load %arg6[%c0, %c0_0, %c0_1, %c0_2] : memref<1x9x9x128xf32, #tpu.memory_space<vmem>>, vector<1x9x9x128xf32>
    tpu.vector_store %arg6[%c0, %c0_0, %c0_1, %c0_2], %0 {strides = array<i32>} : memref<1x9x9x128xf32, #tpu.memory_space<vmem>>, vector<1x9x9x128xf32>,
    %c0_3 = arith.constant 0 : index
    %c0_4 = arith.constant 0 : index
    %c0_5 = arith.constant 0 : index
    %c0_6 = arith.constant 0 : index
    %2 = vector.load %arg1[%c0_3, %c0_4, %c0_5, %c0_6] : memref<1x7x7x128xf32, #tpu.memory_space<vmem>>, vector<1x7x7x128xf32>
    %c0_7 = arith.constant 0 : index
    %c1 = arith.constant 1 : index
    %c1_8 = arith.constant 1 : index
    %c0_9 = arith.constant 0 : index
    %3 = vector.load %arg6[%c0_7, %c1, %c1_8, %c0_9] : memref<1x9x9x128xf32, #tpu.memory_space<vmem>>, vector<1x7x7x128xf32>
    tpu.vector_store %arg6[%c0_7, %c1, %c1_8, %c0_9], %2 {strides = array<i32>} : memref<1x9x9x128xf32, #tpu.memory_space<vmem>>, vector<1x7x7x128xf32>,
    %c0_10 = arith.constant 0 : index
    %c0_11 = arith.constant 0 : index
    %c0_12 = arith.constant 0 : index
    %c0_13 = arith.constant 0 : index
    %4 = vector.load %arg6[%c0_10, %c0_11, %c0_12, %c0_13] : memref<1x9x9x128xf32, #tpu.memory_space<vmem>>, vector<1x9x9x128xf32>
    %c0_14 = arith.constant 0 : index
    %c0_15 = arith.constant 0 : index
    %5 = vector.load %arg2[%c0_14, %c0_15] : memref<9x128xf32, #tpu.memory_space<vmem>>, vector<9x128xf32>
    %6 = vector.extract_strided_slice %4 {offsets = [0, 0, 0, 0], sizes = [1, 9, 7, 128], strides = [1, 1, 1, 1]} : vector<1x9x9x128xf32> to vector<1x9x7x128xf32>
    %7 = vector.extract_strided_slice %4 {offsets = [0, 0, 1, 0], sizes = [1, 9, 7, 128], strides = [1, 1, 1, 1]} : vector<1x9x9x128xf32> to vector<1x9x7x128xf32>
    %8 = vector.extract_strided_slice %4 {offsets = [0, 0, 2, 0], sizes = [1, 9, 7, 128], strides = [1, 1, 1, 1]} : vector<1x9x9x128xf32> to vector<1x9x7x128xf32>
    %cst_16 = arith.constant 0.000000e+00 : f32
    %9 = vector.broadcast %cst_16 : f32 to vector<1x7x7x128xf32>
    %10 = vector.extract_strided_slice %6 {offsets = [0, 0, 0, 0], sizes = [1, 7, 7, 128], strides = [1, 1, 1, 1]} : vector<1x9x7x128xf32> to vector<1x7x7x128xf32>
    %11 = vector.extract_strided_slice %5 {offsets = [0, 0], sizes = [1, 128], strides = [1, 1]} : vector<9x128xf32> to vector<1x128xf32>
    %12 = vector.shape_cast %11 : vector<1x128xf32> to vector<128xf32>
    %13 = vector.shape_cast %12 : vector<128xf32> to vector<1x1x1x128xf32>
    %14 = vector.broadcast %13 : vector<1x1x1x128xf32> to vector<1x7x7x128xf32>
    %15 = arith.mulf %10, %14 : vector<1x7x7x128xf32>
    %16 = arith.addf %9, %15 : vector<1x7x7x128xf32>
    %17 = vector.extract_strided_slice %7 {offsets = [0, 0, 0, 0], sizes = [1, 7, 7, 128], strides = [1, 1, 1, 1]} : vector<1x9x7x128xf32> to vector<1x7x7x128xf32>
    %18 = vector.extract_strided_slice %5 {offsets = [1, 0], sizes = [1, 128], strides = [1, 1]} : vector<9x128xf32> to vector<1x128xf32>
    %19 = vector.shape_cast %18 : vector<1x128xf32> to vector<128xf32>
    %20 = vector.shape_cast %19 : vector<128xf32> to vector<1x1x1x128xf32>
    %21 = vector.broadcast %20 : vector<1x1x1x128xf32> to vector<1x7x7x128xf32>
    %22 = arith.mulf %17, %21 : vector<1x7x7x128xf32>
    %23 = arith.addf %16, %22 : vector<1x7x7x128xf32>
    %24 = vector.extract_strided_slice %8 {offsets = [0, 0, 0, 0], sizes = [1, 7, 7, 128], strides = [1, 1, 1, 1]} : vector<1x9x7x128xf32> to vector<1x7x7x128xf32>
    %25 = vector.extract_strided_slice %5 {offsets = [2, 0], sizes = [1, 128], strides = [1, 1]} : vector<9x128xf32> to vector<1x128xf32>
    %26 = vector.shape_cast %25 : vector<1x128xf32> to vector<128xf32>
    %27 = vector.shape_cast %26 : vector<128xf32> to vector<1x1x1x128xf32>
    %28 = vector.broadcast %27 : vector<1x1x1x128xf32> to vector<1x7x7x128xf32>
    %29 = arith.mulf %24, %28 : vector<1x7x7x128xf32>
    %30 = arith.addf %23, %29 : vector<1x7x7x128xf32>
    %31 = vector.extract_strided_slice %6 {offsets = [0, 1, 0, 0], sizes = [1, 7, 7, 128], strides = [1, 1, 1, 1]} : vector<1x9x7x128xf32> to vector<1x7x7x128xf32>
    %32 = vector.extract_strided_slice %5 {offsets = [3, 0], sizes = [1, 128], strides = [1, 1]} : vector<9x128xf32> to vector<1x128xf32>
    %33 = vector.shape_cast %32 : vector<1x128xf32> to vector<128xf32>
    %34 = vector.shape_cast %33 : vector<128xf32> to vector<1x1x1x128xf32>
    %35 = vector.broadcast %34 : vector<1x1x1x128xf32> to vector<1x7x7x128xf32>
    %36 = arith.mulf %31, %35 : vector<1x7x7x128xf32>
    %37 = arith.addf %30, %36 : vector<1x7x7x128xf32>
    %38 = vector.extract_strided_slice %7 {offsets = [0, 1, 0, 0], sizes = [1, 7, 7, 128], strides = [1, 1, 1, 1]} : vector<1x9x7x128xf32> to vector<1x7x7x128xf32>
    %39 = vector.extract_strided_slice %5 {offsets = [4, 0], sizes = [1, 128], strides = [1, 1]} : vector<9x128xf32> to vector<1x128xf32>
    %40 = vector.shape_cast %39 : vector<1x128xf32> to vector<128xf32>
    %41 = vector.shape_cast %40 : vector<128xf32> to vector<1x1x1x128xf32>
    %42 = vector.broadcast %41 : vector<1x1x1x128xf32> to vector<1x7x7x128xf32>
    %43 = arith.mulf %38, %42 : vector<1x7x7x128xf32>
    %44 = arith.addf %37, %43 : vector<1x7x7x128xf32>
    %45 = vector.extract_strided_slice %8 {offsets = [0, 1, 0, 0], sizes = [1, 7, 7, 128], strides = [1, 1, 1, 1]} : vector<1x9x7x128xf32> to vector<1x7x7x128xf32>
    %46 = vector.extract_strided_slice %5 {offsets = [5, 0], sizes = [1, 128], strides = [1, 1]} : vector<9x128xf32> to vector<1x128xf32>
    %47 = vector.shape_cast %46 : vector<1x128xf32> to vector<128xf32>
    %48 = vector.shape_cast %47 : vector<128xf32> to vector<1x1x1x128xf32>
    %49 = vector.broadcast %48 : vector<1x1x1x128xf32> to vector<1x7x7x128xf32>
    %50 = arith.mulf %45, %49 : vector<1x7x7x128xf32>
    %51 = arith.addf %44, %50 : vector<1x7x7x128xf32>
    %52 = vector.extract_strided_slice %6 {offsets = [0, 2, 0, 0], sizes = [1, 7, 7, 128], strides = [1, 1, 1, 1]} : vector<1x9x7x128xf32> to vector<1x7x7x128xf32>
    %53 = vector.extract_strided_slice %5 {offsets = [6, 0], sizes = [1, 128], strides = [1, 1]} : vector<9x128xf32> to vector<1x128xf32>
    %54 = vector.shape_cast %53 : vector<1x128xf32> to vector<128xf32>
    %55 = vector.shape_cast %54 : vector<128xf32> to vector<1x1x1x128xf32>
    %56 = vector.broadcast %55 : vector<1x1x1x128xf32> to vector<1x7x7x128xf32>
    %57 = arith.mulf %52, %56 : vector<1x7x7x128xf32>
    %58 = arith.addf %51, %57 : vector<1x7x7x128xf32>
    %59 = vector.extract_strided_slice %7 {offsets = [0, 2, 0, 0], sizes = [1, 7, 7, 128], strides = [1, 1, 1, 1]} : vector<1x9x7x128xf32> to vector<1x7x7x128xf32>
    %60 = vector.extract_strided_slice %5 {offsets = [7, 0], sizes = [1, 128], strides = [1, 1]} : vector<9x128xf32> to vector<1x128xf32>
    %61 = vector.shape_cast %60 : vector<1x128xf32> to vector<128xf32>
    %62 = vector.shape_cast %61 : vector<128xf32> to vector<1x1x1x128xf32>
    %63 = vector.broadcast %62 : vector<1x1x1x128xf32> to vector<1x7x7x128xf32>
    %64 = arith.mulf %59, %63 : vector<1x7x7x128xf32>
    %65 = arith.addf %58, %64 : vector<1x7x7x128xf32>
    %66 = vector.extract_strided_slice %8 {offsets = [0, 2, 0, 0], sizes = [1, 7, 7, 128], strides = [1, 1, 1, 1]} : vector<1x9x7x128xf32> to vector<1x7x7x128xf32>
    %67 = vector.extract_strided_slice %5 {offsets = [8, 0], sizes = [1, 128], strides = [1, 1]} : vector<9x128xf32> to vector<1x128xf32>
    %68 = vector.shape_cast %67 : vector<1x128xf32> to vector<128xf32>
    %69 = vector.shape_cast %68 : vector<128xf32> to vector<1x1x1x128xf32>
    %70 = vector.broadcast %69 : vector<1x1x1x128xf32> to vector<1x7x7x128xf32>
    %71 = arith.mulf %66, %70 : vector<1x7x7x128xf32>
    %72 = arith.addf %65, %71 : vector<1x7x7x128xf32>
    %cst_17 = arith.constant dense<0.000000e+00> : vector<128xf32>
    %73 = vector.multi_reduction <add>, %72, %cst_17 [0, 1, 2] : vector<1x7x7x128xf32> to vector<128xf32>
    %74 = vector.shape_cast %73 : vector<128xf32> to vector<1x1x1x128xf32>
    %75 = arith.mulf %72, %72 : vector<1x7x7x128xf32>
    %cst_18 = arith.constant dense<0.000000e+00> : vector<128xf32>
    %76 = vector.multi_reduction <add>, %75, %cst_18 [0, 1, 2] : vector<1x7x7x128xf32> to vector<128xf32>
    %77 = vector.shape_cast %76 : vector<128xf32> to vector<1x1x1x128xf32>
    %cst_19 = arith.constant 0.0204081628 : f32
    %78 = vector.broadcast %cst_19 : f32 to vector<1x1x1x128xf32>
    %79 = arith.mulf %74, %78 : vector<1x1x1x128xf32>
    %cst_20 = arith.constant 0.0204081628 : f32
    %80 = vector.broadcast %cst_20 : f32 to vector<1x1x1x128xf32>
    %81 = arith.mulf %77, %80 : vector<1x1x1x128xf32>
    %82 = arith.mulf %79, %79 : vector<1x1x1x128xf32>
    %83 = arith.subf %81, %82 : vector<1x1x1x128xf32>
    %cst_21 = arith.constant 9.99999974E-6 : f32
    %84 = vector.broadcast %cst_21 : f32 to vector<1x1x1x128xf32>
    %85 = arith.addf %83, %84 : vector<1x1x1x128xf32>
    %86 = math.rsqrt %85 : vector<1x1x1x128xf32>
    %c0_22 = arith.constant 0 : index
    %c0_23 = arith.constant 0 : index
    %87 = vector.load %arg3[%c0_22, %c0_23] : memref<1x128xf32, #tpu.memory_space<vmem>>, vector<1x128xf32>
    %88 = vector.shape_cast %87 : vector<1x128xf32> to vector<128xf32>
    %c0_24 = arith.constant 0 : index
    %c0_25 = arith.constant 0 : index
    %89 = vector.load %arg4[%c0_24, %c0_25] : memref<1x128xf32, #tpu.memory_space<vmem>>, vector<1x128xf32>
    %90 = vector.shape_cast %89 : vector<1x128xf32> to vector<128xf32>
    %91 = vector.shape_cast %88 : vector<128xf32> to vector<1x1x1x128xf32>
    %92 = arith.mulf %86, %91 : vector<1x1x1x128xf32>
    %93 = arith.mulf %79, %92 : vector<1x1x1x128xf32>
    %94 = vector.shape_cast %90 : vector<128xf32> to vector<1x1x1x128xf32>
    %95 = arith.subf %94, %93 : vector<1x1x1x128xf32>
    %96 = vector.broadcast %92 : vector<1x1x1x128xf32> to vector<1x7x7x128xf32>
    %97 = arith.mulf %72, %96 : vector<1x7x7x128xf32>
    %98 = vector.broadcast %95 : vector<1x1x1x128xf32> to vector<1x7x7x128xf32>
    %99 = arith.addf %97, %98 : vector<1x7x7x128xf32>
    %c0_26 = arith.constant 0 : index
    %c0_27 = arith.constant 0 : index
    %c0_28 = arith.constant 0 : index
    %c0_29 = arith.constant 0 : index
    %100 = vector.load %arg5[%c0_26, %c0_27, %c0_28, %c0_29] : memref<1x7x7x128xf32, #tpu.memory_space<vmem>>, vector<1x7x7x128xf32>
    tpu.vector_store %arg5[%c0_26, %c0_27, %c0_28, %c0_29], %99 {strides = array<i32>} : memref<1x7x7x128xf32, #tpu.memory_space<vmem>>, vector<1x7x7x128xf32>,
    return
  }
  func.func @transform_0(%arg0: i32) -> (i32, i32, i32, i32) {
    %c0_i32 = arith.constant 0 : i32
    %c0_i32_0 = arith.constant 0 : i32
    %c0_i32_1 = arith.constant 0 : i32
    %c0_i32_2 = arith.constant 0 : i32
    return %c0_i32, %c0_i32_0, %c0_i32_1, %arg0 : i32, i32, i32, i32
  }
  func.func @transform_1(%arg0: i32) -> (i32, i32) {
    %c0_i32 = arith.constant 0 : i32
    %c0_i32_0 = arith.constant 0 : i32
    return %c0_i32, %arg0 : i32, i32
  }
  func.func @transform_2(%arg0: i32) -> (i32, i32) {
    %c0_i32 = arith.constant 0 : i32
    %c0_i32_0 = arith.constant 0 : i32
    return %c0_i32, %arg0 : i32, i32
  }
  func.func @transform_3(%arg0: i32) -> (i32, i32) {
    %c0_i32 = arith.constant 0 : i32
    %c0_i32_0 = arith.constant 0 : i32
    return %c0_i32, %arg0 : i32, i32
  }
  func.func @transform_4(%arg0: i32) -> (i32, i32, i32, i32) {
    %c0_i32 = arith.constant 0 : i32
    %c0_i32_0 = arith.constant 0 : i32
    %c0_i32_1 = arith.constant 0 : i32
    %c0_i32_2 = arith.constant 0 : i32
    return %c0_i32, %c0_i32_0, %c0_i32_1, %arg0 : i32, i32, i32, i32
  }
}

</mosaic_0001>

<bundles_post_ra>
// kernel: tpu_custom_call.1
= control target key start
LH: loop header
LB: loop body
LE: loop exit
PB: predicated region body
PF: predicated region fallthrough
CT: control target
= control target key end

     0   :  { %s1099_s15 = smov 0   ;;  %s1101_s16 = smov 0   ;;  %s1488_s0 = inlined_call_operand.vmem [shape: f32[1,7,7,256], index: 0, kind: input, shape index: {}]   ;;  %s1489_s1 = inlined_call_operand.vmem [shape: f32[9,256], index: 1, kind: input, shape index: {}]   ;;  %s1490_s2 = inlined_call_operand.vmem [shape: f32[1,256], index: 2, kind: input, shape index: {}]   ;;  %s1491_s3 = inlined_call_operand.vmem [shape: f32[1,256], index: 3, kind: input, shape index: {}]   ;;  %s1492_s4 = inlined_call_operand.vmem [shape: f32[1,7,7,256], index: 4, kind: output, shape index: {}]  }
   0x1   :  { %s1103_s17 = smov 0  }
   0x2 LB: > { %s1115_s18 = sadd.s32 4294967295, %s1071_s17   ;;  %s1118_s19 = sadd.s32 1, %s1071_s17   ;;  %s1071_s17 = sphi %s1103_s17, %s1508_s17   ;;  %s1067_s16 = sphi %s1101_s16, %s1507_s16   ;;  %s1063_s15 = sphi %s1099_s15, %s1506_s15  }
   0x3   : > { %s18_s20 = ssub.s32 %s1071_s17, %s1118_s19  ;;  %s21_s21 = sadd.s32 1, %s1067_s16 }
   0x4   : > { %p19_p0 = scmp.eq.s32.totalorder %s18_s20, 0  ;;  %p28_p1 = scmp.ne.s32.totalorder %s1067_s16, %s1063_s15 }
   0x5   : > { %p29_p2 = scmp.eq.s32.totalorder %s1071_s17, 0  ;;  %p136_p3 = scmp.eq.s32.totalorder %s1115_s18, 1 }
   0x6   : > { %s1128_s22 = scalar_select %p19_p0, %s1067_s16, %s21_s21  }
   0x7   : > { %p1130_p4 = por %p29_p2, %p28_p1  ;;  %p1134_p5 = por %p136_p3, %p28_p1 }
   0x8   : > { %p1010_p6 = scmp.ge.s32.totalorder %s1071_s17, 2 }
   0xa   : > { %158 = sbr.rel (%p1010_p6) target bundleno = 32 (0x20), region = 16 }
  0x11   : > { %161 = sbr.rel (!%p1130_p4) target bundleno = 25 (0x19), region = 20  ;;  %s163_s25 = sand.u32 (%p1130_p4), 1, %s1067_s16  }
  0x12   : > { %s1011_s26 = sshll.u32 (%p1130_p4), %s1071_s17, 3  ;;  %s1020_s27 = smul.u32 (%p1130_p4), 56, %s163_s25 }
  0x13   : > { %s167_s30 = scalar_lea.vmem (%p1130_p4), %s1488_s0, %s1011_s26 }
  0x14   : > { %v207_v0 = vld [vmem:[%s167_s30] sm:$0xff] (%p1130_p4)  ;;  %v209_v1 = vld [vmem:[%s167_s30 + $0x10] sm:$0xff] (%p1130_p4)  ;;  %s165_s5 = scalar_lea.vmem (%p1130_p4), [#allocation3], %s1020_s27 }
  0x15   : > { %v211_v2 = vld [vmem:[%s167_s30 + $0x20] sm:$0xff] (%p1130_p4)  ;;  %v213_v3 = vld [vmem:[%s167_s30 + $0x30] sm:$0xff] (%p1130_p4)  ;;  %208 = vst [vmem:[%s165_s5] sm:$0xff] (%p1130_p4), %v207_v0  ;;  %210 = vst [vmem:[%s165_s5 + $0x8] sm:$0xff] (%p1130_p4), %v209_v1 }
  0x16   : > { %v215_v4 = vld [vmem:[%s167_s30 + $0x40] sm:$0xff] (%p1130_p4)  ;;  %v217_v5 = vld [vmem:[%s167_s30 + $0x50] sm:$0xff] (%p1130_p4)  ;;  %212 = vst [vmem:[%s165_s5 + $0x10] sm:$0xff] (%p1130_p4), %v211_v2  ;;  %214 = vst [vmem:[%s165_s5 + $0x18] sm:$0xff] (%p1130_p4), %v213_v3 }
  0x17   : > { %216 = vst [vmem:[%s165_s5 + $0x20] sm:$0xff] (%p1130_p4), %v215_v4  ;;  %218 = vst [vmem:[%s165_s5 + $0x28] sm:$0xff] (%p1130_p4), %v217_v5  ;;  %v219_v6 = vld [vmem:[%s167_s30 + $0x60] sm:$0xff] (%p1130_p4) }
  0x18   : > { %220 = vst [vmem:[%s165_s5 + $0x30] sm:$0xff] %v219_v6 }
  0x19 PF: > { %226 = sbr.rel (!%p1130_p4) target bundleno = 32 (0x20), region = 58  ;;  %s228_s6 = sand.u32 (%p1130_p4), 1, %s1067_s16  }
  0x1a   : > { %s1013_s7 = sshll.u32 (%p1130_p4), %s1071_s17, 3  ;;  %s1012_s8 = sshll.u32 (%p1130_p4), %s228_s6, 4 }
  0x1b   : > { %s232_s11 = scalar_lea.vmem (%p1130_p4), %s1489_s1, %s1013_s7  ;;  %s230_s12 = scalar_lea.vmem (%p1130_p4), [#allocation4], %s1012_s8 }
  0x1c   : > { %v262_v7 = vld [vmem:[%s232_s11] sm:$0xff] (%p1130_p4)  ;;  %v264_v8 = vld [vmem:[%s232_s11 + $0x10] sm:$0xff] (%p1130_p4) }
  0x1d   : > { %263 = vst [vmem:[%s230_s12] sm:$0xff] (%p1130_p4), %v262_v7  ;;  %265 = vst [vmem:[%s230_s12 + $0x8] sm:$0xff] (%p1130_p4), %v264_v8 }
  0x20 PF: > { %p1014_p7 = scmp.ge.s32.totalorder %s1071_s17, 1  ;;  %p282_p8 = scmp.lt.s32.totalorder %s1071_s17, 3 }
  0x22   : > { %p283_p9 = pnand %p1014_p7, %p282_p8 }
  0x24   : > { %286 = sbr.rel (%p283_p9) target bundleno = 179 (0xb3), region = 104 }
  0x2b   : > { %s289_s13 = sand.u32 1, %s1063_s15   ;;  %v389_v9 = vlaneseq  ;;  %v1073_v10 = vmov 0.0   ;;  %vm478_vm0 = vcmask 1045504   ;;  %vm762_vm1 = vcmask 1046528   ;;  %p330_p10 = scmp.lt.s32.totalorder %s1115_s18, 1 }
  0x2c   : > { %337 = vst [vmem:[#allocation2 + $0x8] sm:$0x1] %v1073_v10  ;;  %338 = vst [vmem:[#allocation2 + $0x10] sm:$0xff] %v1073_v10  ;;  %s1156_s14 = smul.u32 56, %s289_s13  ;;  %s1015_s15 = sshll.u32 %s289_s13, 4 }
  0x2d   : > { %339 = vst [vmem:[#allocation2 + $0x18] sm:$0x1] %v1073_v10  ;;  %340 = vst [vmem:[#allocation2 + $0x20] sm:$0xff] %v1073_v10  ;;  %v390_v11 = vshrl.u32 %v389_v9, 7  ;;  %s298_s17 = scalar_lea.vmem [#allocation4], %s1015_s15  ;;  %s1017_s5 = sshll.u32 (%p1134_p5), %s1115_s18, 3 }
  0x2e   : > { %341 = vst [vmem:[#allocation2 + $0x28] sm:$0x1] %v1073_v10  ;;  %342 = vst [vmem:[#allocation2 + $0x30] sm:$0xff] %v1073_v10  ;;  %v387_v12 = vld [vmem:[%s298_s17] sm:$0xff]  ;;  %v1158_v13 = vld [vmem:[%s298_s17 + $0x8] ss:$0 sm:$0xff]  ;;  %s858_s8 = scalar_lea.vmem (%p1134_p5), %s1492_s4, %s1017_s5 }
  0x2f   : > { %343 = vst [vmem:[#allocation2 + $0x38] sm:$0x1] %v1073_v10  ;;  %344 = vst [vmem:[#allocation2 + $0x40] sm:$0xff] %v1073_v10  ;;  %s291_s20 = scalar_lea.vmem [#allocation3], %s1156_s14  ;;  %v409_v15 = vsub.s32 1, %v390_v11  ;;  %v448_v16 = vsub.s32 2, %v390_v11 }
  0x30   : > { %345 = vst [vmem:[#allocation2 + $0x48] sm:$0x1] %v1073_v10  ;;  %346 = vst [vmem:[#allocation2 + $0x50] sm:$0xff] %v1073_v10  ;;  %v354_v14 = vld [vmem:[%s291_s20] sm:$0x7f]  ;;  %v516_v17 = vsub.s32 3, %v390_v11 }
  0x31   : > { %347 = vst [vmem:[#allocation2 + $0x58] sm:$0x1] %v1073_v10  ;;  %348 = vst [vmem:[#allocation2 + $0x60] sm:$0xff] %v1073_v10  ;;  %v534_v18 = vsub.s32 4, %v390_v11  ;;  %v573_v19 = vsub.s32 5, %v390_v11  ;;  %v640_v20 = vsub.s32 6, %v390_v11  ;;  %v1161_v23 = vrot.slane %v387_v12, %v409_v15 }
  0x32   : > { %349 = vst [vmem:[#allocation2 + $0x68] sm:$0x1] %v1073_v10  ;;  %350 = vst [vmem:[#allocation2 + $0x70] sm:$0xff] %v1073_v10  ;;  %v658_v21 = vsub.s32 7, %v390_v11  ;;  %v355_v22 = vld [vmem:[%s291_s20 + $0x8] sm:$0x7f]  ;;  %v1166_v28 = vrot.slane %v387_v12, %v448_v16  ;;  %v1188_v41 = vrot.slane %v387_v12, %v516_v17 }
  0x33   : > { %351 = vst [vmem:[#allocation2 + $0x78] sm:$0x1] %v1073_v10  ;;  %353 = vst [vmem:[#allocation2 + $0x88] sm:$0x1] %v1073_v10  ;;  %v1164_v24 = vmul.f32 0.0, %v1158_v13  ;;  %v1168_v29 = vrot.slane %v387_v12, %v573_v19  ;;  %v1172_v34 = vrot.slane %v387_v12, %v640_v20  ;;  %v411_v40 = vmul.f32 0.0, %v1161_v23 }
  0x34   : > { %362 = vst [vmem:[#allocation2 + $0x11] sm:$0x7f] %v354_v14  ;;  %363 = vst [vmem:[#allocation2 + $0x21] sm:$0x7f] %v355_v22  ;;  %v356_v25 = vld [vmem:[%s291_s20 + $0x10] sm:$0x7f]  ;;  %v1190_v42 = vrot.slane %v387_v12, %v534_v18  ;;  %v1192_v43 = vrot.slane %v387_v12, %v658_v21 }
  0x35   : > { %1498 = vst [vmem:[#allocation6_spill] sm:$0xff] %v1164_v24  ;;  %v357_v26 = vld [vmem:[%s291_s20 + $0x18] sm:$0x7f]  ;;  %v358_v27 = vld [vmem:[%s291_s20 + $0x20] sm:$0x7f]  ;;  %v1198_v46 = vmul.f32 0.0, %v1172_v34 }
  0x36   : > { %364 = vst [vmem:[#allocation2 + $0x31] sm:$0x7f] %v356_v25  ;;  %365 = vst [vmem:[#allocation2 + $0x41] sm:$0x7f] %v357_v26  ;;  %v359_v30 = vld [vmem:[%s291_s20 + $0x28] sm:$0x7f] }
  0x37   : > { %366 = vst [vmem:[#allocation2 + $0x51] sm:$0x7f] %v358_v27  ;;  %v360_v31 = vld [vmem:[%s291_s20 + $0x30] sm:$0x7f]  ;;  %367 = vst [vmem:[#allocation2 + $0x61] sm:$0x7f] %v359_v30 }
  0x38   : > { %368 = vst [vmem:[#allocation2 + $0x71] sm:$0x7f] %v360_v31  ;;  %v370_v38 = vld [vmem:[#allocation2 + $0x8] sm:$0x1]  ;;  %v1185_v39 = vld [vmem:[#allocation2 + $0x18] sm:$0x1] }
  0x39   : > { %v1170_v32 = vld [vmem:[#allocation2 + $0x68] sm:$0x1]  ;;  %v1203_v48 = vld [vmem:[#allocation2 + $0x38] sm:$0x1]  ;;  %v1207_v50 = vsub.s32 0, %v390_v11  ;;  %v1210_v51 = vmul.f32 0.0, %v1166_v28  ;;  %v451_v56 = vmul.f32 %v1166_v28, %v370_v38  ;;  %v453_v57 = vmul.f32 %v1166_v28, %v1185_v39 }
  0x3a   : > { %v384_v33 = vld [vmem:[#allocation2 + $0x78] sm:$0x1]  ;;  %v1176_v35 = vmul.f32 %v1166_v28, %v1170_v32  ;;  %v1180_v36 = vmul.f32 %v1168_v29, %v1170_v32  ;;  %v1195_v45 = vld [vmem:[#allocation2 + $0x28] sm:$0x1]  ;;  %v425_v61 = vrot.slane %v411_v40, 1  ;;  %v457_v3 = vmul.f32 %v1166_v28, %v1203_v48  ;;  %s331_s21 = scalar_select %p330_p10, %s1115_s18, 1 }
  0x3b   : > { %v1183_v37 = vmul.f32 %v1168_v29, %v384_v33  ;;  %v1201_v47 = vmul.f32 %v1158_v13, %v384_v33  ;;  %v1205_v49 = vld [vmem:[#allocation2 + $0x48] sm:$0x1]  ;;  %1499 = vst [vmem:[#allocation7_spill] sm:$0xff] %v1207_v50  ;;  %v1214_v54 = vld [vmem:[#allocation2 + $0x10] sm:$0xff]  ;;  %v1216_v55 = vld [vmem:[#allocation2 + $0x58] sm:$0x1]  ;;  %v392_v60 = vrot.slane %v387_v12, %v1207_v50  ;;  %v455_v62 = vmul.f32 %v1166_v28, %v1195_v45 }
  0x3c   : > { %v1221_v58 = vld [vmem:[#allocation2 + $0x20] sm:$0xff]  ;;  %v412_v1 = vmul.f32 %v1161_v23, %v1214_v54  ;;  %v452_v2 = vmul.f32 %v1166_v28, %v1214_v54  ;;  %v459_v4 = vmul.f32 %v1166_v28, %v1205_v49  ;;  %v461_v9 = vmul.f32 %v1166_v28, %v1216_v55  ;;  %s332_s26 = scalar_lea.vmem %s1490_s2, %s331_s21  ;;  %s335_s29 = scalar_lea.vmem %s1491_s3, %s331_s21 }
  0x3d   : > { %v1227_v63 = vld [vmem:[#allocation2 + $0x30] sm:$0xff]  ;;  %v1229_v0 = vld [vmem:[#allocation2 + $0x40] sm:$0xff]  ;;  %v413_v7 = vmul.f32 %v1161_v23, %v1221_v58  ;;  %v454_v8 = vmul.f32 %v1166_v28, %v1221_v58  ;;  %v479_v10 = vrot.slane %v1210_v51, 2  ;;  %v393_v12 = vmul.f32 0.0, %v392_v60  ;;  %s329_s30 = scalar_lea.vmem [#allocation5], %s1156_s14 }
  0x3e   : > { %v1239_v5 = vld [vmem:[#allocation2 + $0x50] sm:$0xff]  ;;  %v1241_v6 = vld [vmem:[#allocation2 + $0x60] sm:$0xff]  ;;  %v394_v14 = vmul.f32 %v392_v60, %v1214_v54  ;;  %v395_v15 = vmul.f32 %v392_v60, %v1221_v58  ;;  %v396_v16 = vmul.f32 %v392_v60, %v1227_v63  ;;  %v397_v17 = vmul.f32 %v392_v60, %v1229_v0 }
  0x3f   : > { %v462_v11 = vmul.f32 %v1166_v28, %v1241_v6  ;;  %v414_v18 = vmul.f32 %v1161_v23, %v1227_v63  ;;  %v415_v19 = vmul.f32 %v1161_v23, %v1229_v0  ;;  %v399_v20 = vmul.f32 %v392_v60, %v1241_v6 }
  0x40   : > { %v416_v21 = vmul.f32 %v1161_v23, %v1239_v5  ;;  %v417_v22 = vmul.f32 %v1161_v23, %v1241_v6  ;;  %v426_v25 = vrot.slane %v412_v1, 1  ;;  %v398_v26 = vmul.f32 %v392_v60, %v1239_v5 }
  0x41   : > { %v427_v27 = vrot.slane %v413_v7, 1  ;;  %v428_v30 = vrot.slane %v414_v18, 1  ;;  %v429_v31 = vrot.slane %v415_v19, 1  ;;  %v497_v33 = vrot.slane %v462_v11, 2  ;;  %v1272_v19 = vld [vmem:[#allocation2 + $0x70] sm:$0xff] }
  0x42   : > { %v430_v38 = vrot.slane %v416_v21, 1  ;;  %v431_v40 = vrot.slane %v417_v22, 1  ;;  %v439_v51 = vadd.f32 %v425_v61, %v393_v12  ;;  %v440_v44 = vadd.f32 %v426_v25, %v394_v14 }
  0x43   : > { %v441_v59 = vadd.f32 %v427_v27, %v395_v15  ;;  %v442_v53 = vadd.f32 %v428_v30, %v396_v16  ;;  %v456_v52 = vmul.f32 %v1166_v28, %v1227_v63  ;;  %v443_v50 = vadd.f32 %v429_v31, %v397_v17 }
  0x44   : > { %v445_v24 = vadd.f32 %v431_v40, %v399_v20  ;;  %v458_v23 = vmul.f32 %v1166_v28, %v1229_v0  ;;  %v460_v60 = vmul.f32 %v1166_v28, %v1239_v5  ;;  %v480_v1 = vrot.slane %v451_v56, 2 }
  0x45   : > { %v482_v7 = vrot.slane %v452_v2, 2  ;;  %v483_v11 = vrot.slane %v453_v57, 2  ;;  %v485_v18 = vrot.slane %v454_v8, 2  ;;  %v486_v61 = vrot.slane %v455_v62, 2 }
  0x46   : > { %v488_v12 = vrot.slane %v456_v52, 2  ;;  %v489_v14 = vrot.slane %v457_v3, 2  ;;  %v491_v15 = vrot.slane %v458_v23, 2  ;;  %v481_v16 = vsel %vm478_vm0, %v479_v10, %v480_v1 }
  0x47   : > { %v484_v17 = vsel %vm478_vm0, %v482_v7, %v483_v11  ;;  %v492_v20 = vrot.slane %v459_v4, 2  ;;  %v494_v21 = vrot.slane %v460_v60, 2  ;;  %v1500_v22 = vrot.slane %v1176_v35, 2 }
  0x48   : > { %v487_v56 = vsel %vm478_vm0, %v485_v18, %v486_v61  ;;  %v490_v57 = vsel %vm478_vm0, %v488_v12, %v489_v14  ;;  %v495_v2 = vrot.slane %v461_v9, 2  ;;  %v524_v52 = vmul.f32 %v1188_v41, %v1272_v19 }
  0x49   : > { %v499_v28 = vsel %vm478_vm0, %v497_v33, %v1500_v22  ;;  %v444_v62 = vadd.f32 %v430_v38, %v398_v26  ;;  %v493_v3 = vsel %vm478_vm0, %v491_v15, %v492_v20  ;;  %v507_v8 = vadd.f32 %v481_v16, %v439_v51 }
  0x4a   : > { %v496_v10 = vsel %vm478_vm0, %v494_v21, %v495_v2  ;;  %v508_v4 = vadd.f32 %v484_v17, %v440_v44  ;;  %v509_v25 = vadd.f32 %v487_v56, %v441_v59  ;;  %v518_v35 = vmul.f32 %v1188_v41, %v1214_v54 }
  0x4b   : > { %v1289_v27 = vmul.f32 %v1168_v29, %v1272_v19  ;;  %v510_v30 = vadd.f32 %v490_v57, %v442_v53  ;;  %v511_v9 = vadd.f32 %v493_v3, %v443_v50  ;;  %v513_v31 = vadd.f32 %v499_v28, %v445_v24 }
  0x4c   : > { %v519_v26 = vmul.f32 %v1188_v41, %v1221_v58  ;;  %v520_v33 = vmul.f32 %v1188_v41, %v1227_v63  ;;  %v521_v44 = vmul.f32 %v1188_v41, %v1229_v0  ;;  %v522_v59 = vmul.f32 %v1188_v41, %v1239_v5 }
  0x4d   : > { %v512_v38 = vadd.f32 %v496_v10, %v444_v62  ;;  %v523_v40 = vmul.f32 %v1188_v41, %v1241_v6  ;;  %v525_v51 = vadd.f32 %v518_v35, %v507_v8  ;;  %v536_v24 = vmul.f32 %v1190_v42, %v1214_v54 }
  0x4e   : > { %v526_v50 = vadd.f32 %v519_v26, %v508_v4  ;;  %v527_v53 = vadd.f32 %v520_v33, %v509_v25  ;;  %v537_v23 = vmul.f32 %v1190_v42, %v1221_v58  ;;  %v538_v60 = vmul.f32 %v1190_v42, %v1227_v63  ;;  %v386_v26 = vld [vmem:[#allocation2 + $0x88] sm:$0x1] }
  0x4f   : > { %v539_v1 = vmul.f32 %v1190_v42, %v1229_v0  ;;  %v540_v7 = vmul.f32 %v1190_v42, %v1239_v5  ;;  %v541_v41 = vmul.f32 %v1190_v42, %v1241_v6  ;;  %v542_v11 = vmul.f32 %v1190_v42, %v1272_v19 }
  0x50   : > { %v528_v18 = vadd.f32 %v521_v44, %v510_v30  ;;  %v529_v61 = vadd.f32 %v522_v59, %v511_v9  ;;  %v531_v12 = vadd.f32 %v524_v52, %v513_v31  ;;  %v550_v14 = vrot.slane %v536_v24, 1 }
  0x51   : > { %v530_v15 = vadd.f32 %v523_v40, %v512_v38  ;;  %v551_v16 = vrot.slane %v537_v23, 1  ;;  %v552_v17 = vrot.slane %v538_v60, 1  ;;  %v575_v20 = vmul.f32 %v1168_v29, %v1214_v54 }
  0x52   : > { %v553_v21 = vrot.slane %v539_v1, 1  ;;  %v554_v22 = vrot.slane %v540_v7, 1  ;;  %v556_v28 = vrot.slane %v542_v11, 1  ;;  %v576_v56 = vmul.f32 %v1168_v29, %v1185_v39 }
  0x53   : > { %v555_v57 = vrot.slane %v541_v41, 1  ;;  %v564_v2 = vadd.f32 %v550_v14, %v525_v51  ;;  %v565_v62 = vadd.f32 %v551_v16, %v526_v50  ;;  %v566_v42 = vadd.f32 %v552_v17, %v527_v53 }
  0x54   : > { %v577_v52 = vmul.f32 %v1168_v29, %v1221_v58  ;;  %v578_v3 = vmul.f32 %v1168_v29, %v1195_v45  ;;  %v579_v8 = vmul.f32 %v1168_v29, %v1227_v63  ;;  %v580_v54 = vmul.f32 %v1168_v29, %v1203_v48 }
  0x55   : > { %v581_v10 = vmul.f32 %v1168_v29, %v1229_v0  ;;  %v582_v39 = vmul.f32 %v1168_v29, %v1205_v49  ;;  %v583_v4 = vmul.f32 %v1168_v29, %v1239_v5  ;;  %v584_v25 = vmul.f32 %v1168_v29, %v1216_v55 }
  0x56   : > { %v570_v35 = vadd.f32 %v556_v28, %v531_v12  ;;  %v585_v30 = vmul.f32 %v1168_v29, %v1241_v6  ;;  %v603_v9 = vrot.slane %v575_v20, 2  ;;  %v604_v31 = vrot.slane %v576_v56, 2 }
  0x57   : > { %v606_v33 = vrot.slane %v577_v52, 2  ;;  %v607_v44 = vrot.slane %v578_v3, 2  ;;  %v609_v59 = vrot.slane %v579_v8, 2  ;;  %v610_v38 = vrot.slane %v580_v54, 2 }
  0x58   : > { %v612_v40 = vrot.slane %v581_v10, 2  ;;  %v613_v51 = vrot.slane %v582_v39, 2  ;;  %v615_v24 = vrot.slane %v583_v4, 2  ;;  %v616_v50 = vrot.slane %v584_v25, 2 }
  0x59   : > { %v567_v53 = vadd.f32 %v553_v21, %v528_v18  ;;  %v568_v23 = vadd.f32 %v554_v22, %v529_v61  ;;  %v618_v60 = vrot.slane %v585_v30, 2  ;;  %v621_v1 = vrot.slane %v1289_v27, 2 }
  0x5a   : > { %v1339_v7 = vmul.f32 %v1158_v13, %v386_v26  ;;  %v569_v29 = vadd.f32 %v555_v57, %v530_v15  ;;  %v605_v41 = vsel %vm478_vm0, %v603_v9, %v604_v31  ;;  %v617_v11 = vsel %vm478_vm0, %v615_v24, %v616_v50 }
  0x5b   : > { %v608_v12 = vsel %vm478_vm0, %v606_v33, %v607_v44  ;;  %v1501_v14 = vrot.slane %v1180_v36, 2  ;;  %v1502_v18 = vrot.slane %v1183_v37, 2  ;;  %v631_v17 = vadd.f32 %v605_v41, %v564_v2 }
  0x5c   : > { %v611_v27 = vsel %vm478_vm0, %v609_v59, %v610_v38  ;;  %v614_v20 = vsel %vm478_vm0, %v612_v40, %v613_v51  ;;  %v632_v15 = vadd.f32 %v608_v12, %v565_v62  ;;  %v635_v56 = vadd.f32 %v617_v11, %v568_v23 }
  0x5d   : > { %v620_v16 = vsel %vm478_vm0, %v618_v60, %v1501_v14  ;;  %v623_v61 = vsel %vm478_vm0, %v621_v1, %v1502_v18  ;;  %v633_v22 = vadd.f32 %v611_v27, %v566_v42  ;;  %v634_v28 = vadd.f32 %v614_v20, %v567_v53 }
  0x5e   : > { %v637_v21 = vadd.f32 %v623_v61, %v570_v35  ;;  %v642_v57 = vmul.f32 %v1172_v34, %v1221_v58  ;;  %v636_v36 = vadd.f32 %v620_v16, %v569_v29  ;;  %v643_v52 = vmul.f32 %v1172_v34, %v1227_v63 }
  0x5f   : > { %v644_v37 = vmul.f32 %v1172_v34, %v1229_v0  ;;  %v647_v2 = vmul.f32 %v1172_v34, %v1272_v19  ;;  %v645_v62 = vmul.f32 %v1172_v34, %v1239_v5  ;;  %v646_v42 = vmul.f32 %v1172_v34, %v1241_v6 }
  0x60   : > { %v649_v3 = vadd.f32 %v642_v57, %v631_v17  ;;  %v660_v8 = vmul.f32 %v1192_v43, %v1221_v58  ;;  %v655_v54 = vadd.f32 %v1198_v46, %v637_v21  ;;  %v661_v10 = vmul.f32 %v1192_v43, %v1227_v63 }
  0x61   : > { %v662_v39 = vmul.f32 %v1192_v43, %v1229_v0  ;;  %v663_v4 = vmul.f32 %v1192_v43, %v1239_v5  ;;  %v650_v25 = vadd.f32 %v643_v52, %v632_v15  ;;  %v651_v35 = vadd.f32 %v644_v37, %v633_v22 }
  0x62   : > { %v664_v34 = vmul.f32 %v1192_v43, %v1241_v6  ;;  %v665_v30 = vmul.f32 %v1192_v43, %v1272_v19  ;;  %v652_v9 = vadd.f32 %v645_v62, %v634_v28  ;;  %v653_v31 = vadd.f32 %v646_v42, %v635_v56 }
  0x63   : > { %v654_v46 = vadd.f32 %v647_v2, %v636_v36  ;;  %v666_v26 = vmul.f32 0.0, %v1192_v43  ;;  %v674_v33 = vrot.slane %v660_v8, 1  ;;  %v675_v44 = vrot.slane %v661_v10, 1 }
  0x64   : > { %v676_v59 = vrot.slane %v662_v39, 1  ;;  %v677_v38 = vrot.slane %v663_v4, 1  ;;  %v678_v40 = vrot.slane %v664_v34, 1  ;;  %v679_v51 = vrot.slane %v665_v30, 1 }
  0x65   : > { %v699_v24 = vmul.f32 %v1158_v13, %v1221_v58  ;;  %v700_v50 = vmul.f32 %v1158_v13, %v1195_v45  ;;  %v688_v53 = vadd.f32 %v674_v33, %v649_v3  ;;  %v689_v23 = vadd.f32 %v675_v44, %v650_v25  ;;  %v1503_v25 = vld [vmem:[#allocation6_spill] sm:$0xff] }
  0x66   : > { %v690_v60 = vadd.f32 %v676_v59, %v651_v35  ;;  %v701_v1 = vmul.f32 %v1158_v13, %v1227_v63  ;;  %v702_v43 = vmul.f32 %v1158_v13, %v1203_v48  ;;  %v703_v29 = vmul.f32 %v1158_v13, %v1229_v0 }
  0x67   : > { %v704_v41 = vmul.f32 %v1158_v13, %v1205_v49  ;;  %v705_v58 = vmul.f32 %v1158_v13, %v1239_v5  ;;  %v706_v45 = vmul.f32 %v1158_v13, %v1216_v55  ;;  %v707_v11 = vmul.f32 %v1158_v13, %v1241_v6 }
  0x68   : > { %v708_v63 = vmul.f32 %v1158_v13, %v1170_v32  ;;  %v709_v48 = vmul.f32 %v1158_v13, %v1272_v19  ;;  %v727_v12 = vrot.slane %v699_v24, 2  ;;  %v728_v0 = vrot.slane %v700_v50, 2 }
  0x69   : > { %v730_v14 = vrot.slane %v701_v1, 2  ;;  %v731_v16 = vrot.slane %v702_v43, 2  ;;  %v733_v49 = vrot.slane %v703_v29, 2  ;;  %v734_v18 = vrot.slane %v704_v41, 2 }
  0x6a   : > { %v736_v61 = vrot.slane %v705_v58, 2  ;;  %v737_v5 = vrot.slane %v706_v45, 2  ;;  %v680_v17 = vrot.slane %v666_v26, 1  ;;  %v691_v27 = vadd.f32 %v677_v38, %v652_v9 }
  0x6b   : > { %v729_v55 = vsel %vm478_vm0, %v727_v12, %v728_v0  ;;  %v732_v6 = vsel %vm478_vm0, %v730_v14, %v731_v16  ;;  %v739_v20 = vrot.slane %v707_v11, 2  ;;  %v740_v15 = vrot.slane %v708_v63, 2 }
  0x6c   : > { %v742_v32 = vrot.slane %v709_v48, 2  ;;  %v743_v21 = vrot.slane %v1201_v47, 2  ;;  %v692_v13 = vadd.f32 %v678_v40, %v653_v31  ;;  %v735_v19 = vsel %vm478_vm0, %v733_v49, %v734_v18 }
  0x6d   : > { %v1404_v22 = vadd.f32 %v729_v55, %v688_v53  ;;  %v1406_v28 = vadd.f32 %v732_v6, %v689_v23  ;;  %v746_v56 = vrot.slane %v1339_v7, 2  ;;  %v693_v57 = vadd.f32 %v679_v51, %v654_v46 }
  0x6e   : > { %v738_v36 = vsel %vm478_vm0, %v736_v61, %v737_v5  ;;  %v1410_v52 = vadd.f32 %v735_v19, %v690_v60  ;;  %v744_v37 = vsel %vm478_vm0, %v742_v32, %v743_v21  ;;  %v694_v42 = vadd.f32 %v680_v17, %v655_v54 }
  0x6f   : > { %v1413_v2 = vadd.f32 %v738_v36, %v691_v27  ;;  %v763_v47 = vsel %vm762_vm1, %v1404_v22, 0.0  ;;  %v764_v62 = vsel %vm762_vm1, %v1406_v28, 0.0  ;;  %v741_v3 = vsel %vm478_vm0, %v739_v20, %v740_v15  ;;  %v814_v36 = vld [vmem:[%s332_s26] sm:$0x1] }
  0x70   : > { %v765_v8 = vadd.f32 %v764_v62, %v763_v47  ;;  %v1420_v7 = vadd.f32 %v741_v3, %v692_v13  ;;  %v766_v10 = vsel %vm762_vm1, %v1410_v52, 0.0  ;;  %v782_v39 = vmul.f32 %v1404_v22, %v1404_v22  ;;  %v815_v62 = vld [vmem:[%s335_s29] sm:$0x1]  ;;  %v1505_v3 = vld [vmem:[#allocation7_spill] sm:$0xff] }
  0x71   : > { %v783_v4 = vmul.f32 %v1406_v28, %v1406_v28  ;;  %v1504_v35 = vrot.slane %v1503_v25, 2  ;;  %v1431_v30 = vadd.f32 %v744_v37, %v693_v57  ;;  %v784_v9 = vmul.f32 %v1410_v52, %v1410_v52 }
  0x72   : > { %v767_v54 = vadd.f32 %v766_v10, %v765_v8  ;;  %v768_v31 = vsel %vm762_vm1, %v1413_v2, 0.0  ;;  %v785_v46 = vmul.f32 %v1413_v2, %v1413_v2  ;;  %v789_v26 = vsel %vm762_vm1, %v782_v39, 0.0 }
  0x73   : > { %v747_v34 = vsel %vm478_vm0, %v1504_v35, %v746_v56  ;;  %v790_v33 = vsel %vm762_vm1, %v783_v4, 0.0  ;;  %v770_v40 = vsel %vm762_vm1, %v1420_v7, 0.0  ;;  %v786_v51 = vmul.f32 %v1420_v7, %v1420_v7 }
  0x74   : > { %v769_v44 = vadd.f32 %v768_v31, %v767_v54  ;;  %v791_v59 = vadd.f32 %v790_v33, %v789_v26  ;;  %v761_v38 = vadd.f32 %v747_v34, %v694_v42  ;;  %v792_v24 = vsel %vm762_vm1, %v784_v9, 0.0 }
  0x75   : > { %v772_v23 = vsel %vm762_vm1, %v1431_v30, 0.0  ;;  %v787_v60 = vmul.f32 %v1431_v30, %v1431_v30  ;;  %v794_v1 = vsel %vm762_vm1, %v785_v46, 0.0  ;;  %v796_v45 = vsel %vm762_vm1, %v786_v51, 0.0 }
  0x76   : > { %v771_v50 = vadd.f32 %v770_v40, %v769_v44  ;;  %v793_v53 = vadd.f32 %v792_v24, %v791_v59  ;;  %v774_v41 = vsel %vm762_vm1, %v761_v38, 0.0  ;;  %v788_v58 = vmul.f32 %v761_v38, %v761_v38 }
  0x77   : > { %v798_v48 = vsel %vm762_vm1, %v787_v60, 0.0 }
  0x78   : > { %v773_v43 = vadd.f32 %v772_v23, %v771_v50  ;;  %v795_v29 = vadd.f32 %v794_v1, %v793_v53  ;;  %v800_v14 = vsel %vm762_vm1, %v788_v58, 0.0 }
  0x7a   : > { %v775_v11 = vadd.f32 %v774_v41, %v773_v43  ;;  %v797_v63 = vadd.f32 %v796_v45, %v795_v29 }
  0x7c   : > { %v776_v12 = vrot.slane %v775_v11, 4  ;;  %v799_v0 = vadd.f32 %v798_v48, %v797_v63 }
  0x7e   : > { %v777_v16 = vadd.f32 %v776_v12, %v775_v11  ;;  %v801_v49 = vadd.f32 %v800_v14, %v799_v0 }
  0x80   : > { %v778_v18 = vrot.slane %v777_v16, 2  ;;  %v802_v61 = vrot.slane %v801_v49, 4 }
  0x82   : > { %v779_v5 = vadd.f32 %v778_v18, %v777_v16  ;;  %v803_v17 = vadd.f32 %v802_v61, %v801_v49 }
  0x84   : > { %v780_v27 = vrot.slane %v779_v5, 1  ;;  %v804_v55 = vrot.slane %v803_v17, 2 }
  0x86   : > { %v781_v6 = vadd.f32 %v780_v27, %v779_v5  ;;  %v805_v20 = vadd.f32 %v804_v55, %v803_v17 }
  0x88   : > { %v806_v15 = vrot.slane %v805_v20, 1  ;;  %v808_v32 = vmul.f32 0.020408163, %v781_v6 }
  0x8a   : > { %v807_v21 = vadd.f32 %v806_v15, %v805_v20  ;;  %v810_v13 = vmul.f32 %v808_v32, %v808_v32 }
  0x8c   : > { %v809_v19 = vmul.f32 0.020408163, %v807_v21 }
  0x8e   : > { %v811_v56 = vsub.f32 %v809_v19, %v810_v13 }
  0x90   : > { %v812_v57 = vadd.f32 1e-05, %v811_v56 }
  0x92   : > { %1047 = vrsqrt.f32 %v812_v57 }
  0x9c   : > { %v1048_v37 = vpop.eup %1047 }
  0x9d   : > { %v816_v47 = vmul.f32 %v1048_v37, %v814_v36 }
  0x9f   : > { %v817_v42 = vmul.f32 %v816_v47, %v808_v32  ;;  %v822_v8 = vrot.slane %v816_v47, %v1505_v3 }
  0xa1   : > { %v818_v10 = vsub.f32 %v815_v62, %v817_v42  ;;  %v823_v39 = vmul.f32 %v822_v8, %v1404_v22  ;;  %v824_v25 = vmul.f32 %v822_v8, %v1406_v28  ;;  %v825_v35 = vmul.f32 %v822_v8, %v1410_v52 }
  0xa2   : > { %v826_v34 = vmul.f32 %v822_v8, %v1413_v2  ;;  %v827_v54 = vmul.f32 %v822_v8, %v1420_v7  ;;  %v828_v9 = vmul.f32 %v822_v8, %v1431_v30  ;;  %v829_v31 = vmul.f32 %v822_v8, %v761_v38 }
  0xa3   : > { %v834_v4 = vrot.slane %v818_v10, %v1505_v3 }
  0xa4   : > { %856 = sbr.rel (!%p1134_p5) target bundleno = 179 (0xb3), region = 116 }
  0xa5   : > { %v836_v46 = vadd.f32 %v834_v4, %v823_v39  ;;  %v837_v26 = vadd.f32 %v834_v4, %v824_v25  ;;  %v838_v33 = vadd.f32 %v834_v4, %v825_v35  ;;  %v839_v44 = vadd.f32 %v834_v4, %v826_v34 }
  0xa6   : > { %v840_v59 = vadd.f32 %v834_v4, %v827_v54  ;;  %v841_v40 = vadd.f32 %v834_v4, %v828_v9  ;;  %v842_v22 = vadd.f32 %v834_v4, %v829_v31 }
  0xa7   : > { %843 = vst [vmem:[%s329_s30] sm:$0x7f] %v836_v46  ;;  %844 = vst [vmem:[%s329_s30 + $0x8] sm:$0x7f] %v837_v26 }
  0xa8   : > { %845 = vst [vmem:[%s329_s30 + $0x10] sm:$0x7f] %v838_v33  ;;  %846 = vst [vmem:[%s329_s30 + $0x18] sm:$0x7f] %v839_v44 }
  0xa9   : > { %847 = vst [vmem:[%s329_s30 + $0x20] sm:$0x7f] %v840_v59  ;;  %848 = vst [vmem:[%s329_s30 + $0x28] sm:$0x7f] %v841_v40 }
  0xaa   : > { %849 = vst [vmem:[%s329_s30 + $0x30] sm:$0x7f] %v842_v22 }
  0xae   : > { %v898_v28 = vld [vmem:[%s329_s30] sm:$0xff]  ;;  %v900_v52 = vld [vmem:[%s329_s30 + $0x8] sm:$0xff] }
  0xaf   : > { %v902_v2 = vld [vmem:[%s329_s30 + $0x10] sm:$0xff]  ;;  %v904_v7 = vld [vmem:[%s329_s30 + $0x18] sm:$0xff]  ;;  %899 = vst [vmem:[%s858_s8] sm:$0xff] %v898_v28  ;;  %901 = vst [vmem:[%s858_s8 + $0x10] sm:$0xff] %v900_v52 }
  0xb0   : > { %v906_v30 = vld [vmem:[%s329_s30 + $0x20] sm:$0xff]  ;;  %v908_v38 = vld [vmem:[%s329_s30 + $0x28] sm:$0xff]  ;;  %903 = vst [vmem:[%s858_s8 + $0x20] sm:$0xff] %v902_v2  ;;  %905 = vst [vmem:[%s858_s8 + $0x30] sm:$0xff] %v904_v7 }
  0xb1   : > { %907 = vst [vmem:[%s858_s8 + $0x40] sm:$0xff] %v906_v30  ;;  %909 = vst [vmem:[%s858_s8 + $0x50] sm:$0xff] %v908_v38  ;;  %v910_v51 = vld [vmem:[%s329_s30 + $0x30] sm:$0xff] }
  0xb2   : > { %911 = vst [vmem:[%s858_s8 + $0x60] sm:$0xff] %v910_v51 }
  0xb3 PF: > { %p11_p11 = scmp.ge.s32.totalorder %s1118_s19, 4   ;;  %s1506_s15 = smov %s1067_s16 }
  0xb4   : > { %s1507_s16 = smov %s1128_s22  ;;  %s1508_s17 = smov %s1118_s19 }
  0xb5   :  { %13 = sbr.rel (!%p11_p11) target bundleno = 2 (0x2), region = 200 }

</bundles_post_ra>
